<compile_context>
chip_gen: v7x
topology: tpu7x:2x2x1
jax: 0.10.0
libtpu: 0.0.40
codegen_flags: <defaults>
</compile_context>

<pallas_src>
import math

import jax
import jax.numpy as jnp
from jax.experimental import pallas as pl
from jax.experimental.pallas import tpu as pltpu


_INV_SQRT2 = 1.0 / math.sqrt(2.0)


def _gelu_exact(x):
    # nn.GELU() default (approximate='none'): 0.5 * x * (1 + erf(x / sqrt(2)))
    return 0.5 * x * (1.0 + jax.lax.erf(x * _INV_SQRT2))


def _round_up(x, m):
    return (x + m - 1) // m * m


def _vmem_budget_bytes():
    """~80% of this generation's physical VMEM (64 MiB v7x, 128 MiB v5e/v6e)."""
    try:
        cap = int(pltpu.get_tpu_info().vmem_capacity_bytes)
    except Exception:
        cap = 64 * 1024 * 1024  # conservative (v7x per-core) fallback
    return int(cap * 0.8)


def _select_row_tiling(M, tm_max):
    """Row tile minimizing padding; >= 2 tiles when possible (v7x megacore)."""
    n = max(1, -(-M // tm_max))
    if M > 8 and n < 2:
        n = 2                       # give v7x's second TensorCore a tile
    tm = _round_up(-(-M // n), 8)
    n = max(1, -(-M // tm))
    if M > 8 and n < 2:
        n = 2
    return tm, n, n * tm


def _pick_ti(I, ti_max):
    """Lane-aligned intermediate tile; prefers 256-multiples (2x256x256 MXUs)."""
    step = 256 if ti_max >= 256 else 128
    I_pad = _round_up(I, step)
    ti_cap = max(step, (min(ti_max, I_pad) // step) * step)
    for cand in range(ti_cap, step - 1, -step):
        if I_pad % cand == 0:
            return cand, I_pad, step
    return step, I_pad, step


# ---------------------------------------------------------------------------
# Kernels
# ---------------------------------------------------------------------------

def _ffn_kernel_resident(x_ref, w1_ref, b1_ref, w2_ref, b2_ref, o_ref):
    """Weights fully resident in VMEM: one pass per row tile, no reduction axis."""
    h = jnp.dot(x_ref[...], w1_ref[...], preferred_element_type=jnp.float32)
    h = _gelu_exact(h + b1_ref[...])
    y = jnp.dot(h.astype(w2_ref.dtype), w2_ref[...],
                preferred_element_type=jnp.float32)
    # Dropout: identity in eval mode.
    # TODO(synk): training-mode dropout would need pltpu.prng_seed + prng_random_bits.
    o_ref[...] = (y + b2_ref[...]).astype(o_ref.dtype)


def _ffn_kernel_streamed_f32out(x_ref, w1_ref, b1_ref, w2_ref, b2_ref, o_ref):
    """Streamed intermediate dim, accumulating directly into the f32 output block."""
    k = pl.program_id(1)
    h = jnp.dot(x_ref[...], w1_ref[...], preferred_element_type=jnp.float32)
    h = _gelu_exact(h + b1_ref[...])
    part = jnp.dot(h.astype(w2_ref.dtype), w2_ref[...],
                   preferred_element_type=jnp.float32)

    @pl.when(k == 0)
    def _():
        o_ref[...] = part + b2_ref[...]

    @pl.when(k > 0)
    def _():
        o_ref[...] += part


def _ffn_kernel_streamed_acc(x_ref, w1_ref, b1_ref, w2_ref, b2_ref, o_ref, acc_ref):
    """Streamed intermediate dim with an f32 VMEM accumulator (non-f32 outputs)."""
    k = pl.program_id(1)

    @pl.when(k == 0)
    def _():
        acc_ref[...] = jnp.zeros_like(acc_ref)

    h = jnp.dot(x_ref[...], w1_ref[...], preferred_element_type=jnp.float32)
    h = _gelu_exact(h + b1_ref[...])
    acc_ref[...] += jnp.dot(h.astype(w2_ref.dtype), w2_ref[...],
                            preferred_element_type=jnp.float32)

    @pl.when(k == pl.num_programs(1) - 1)
    def _():
        o_ref[...] = (acc_ref[...] + b2_ref[...]).astype(o_ref.dtype)


# ---------------------------------------------------------------------------
# Wrapper
# ---------------------------------------------------------------------------

def feed_forward(x, w1, b1, w2, b2, *, compute_dtype=jnp.bfloat16,
                 tm_max=None, ti_max=512, force_streamed=False):
    """x: (..., H). w1: (H, I), b1: (I,), w2: (I, H), b2: (H,).

    compute_dtype: dtype fed to the MXU (default bfloat16; accumulation is
    always f32). Pre-cast w1/w2 to compute_dtype once outside this function to
    avoid re-reading both weight matrices from HBM for the cast on every call.
    """
    orig_shape = x.shape
    H = orig_shape[-1]
    I = w1.shape[1]
    out_dtype = x.dtype

    budget = _vmem_budget_bytes()
    if tm_max is None:
        # >=128 MiB VMEM parts (v5e/v6e) can amortize weight streaming with
        # bigger row tiles; 64 MiB v7x stays at 512.
        tm_max = 768 if budget >= 96 * 1024 * 1024 else 512

    x_isz = jnp.dtype(compute_dtype).itemsize
    w_isz = jnp.dtype(compute_dtype).itemsize
    o_isz = jnp.dtype(out_dtype).itemsize

    x2d = x.reshape(-1, H)
    M = x2d.shape[0]
    tm, n_rows, M_pad = _select_row_tiling(M, tm_max)

    def _tile_bytes(tm_, ti_, scratch):
        b = 2 * (tm_ * H * x_isz        # x tile (double-buffered)
                 + H * ti_ * w_isz      # W1 slice
                 + 8 * ti_ * 4          # b1 slice (8-sublane padded, f32)
                 + ti_ * H * w_isz      # W2 slice
                 + 8 * H * 4            # b2
                 + tm_ * H * o_isz)     # output tile
        if scratch:
            b += tm_ * H * 4            # f32 accumulator (resident)
        return b

    resident = (not force_streamed) and (_tile_bytes(tm, I, False) <= budget)

    if resident:
        ti, I_pad = I, I
        n_k = 1
        use_scratch = False
    else:
        ti, I_pad, step = _pick_ti(I, ti_max)
        use_scratch = out_dtype != jnp.float32
        # Shrink ti, then tm, until the double-buffered footprint fits VMEM.
        while _tile_bytes(tm, ti, use_scratch) > budget:
            if ti > step:
                ti, I_pad, step = _pick_ti(I, ti - step)
            elif tm > 64:
                tm = max(64, _round_up(tm // 2, 8))
            else:
                break
        tm, n_rows, M_pad = _select_row_tiling(M, tm)
        n_k = I_pad // ti

    # Cast only when needed (no-op if the caller pre-cast the weights).
    if x2d.dtype != compute_dtype:
        x2d = x2d.astype(compute_dtype)
    w1c = w1 if w1.dtype == compute_dtype else w1.astype(compute_dtype)
    w2c = w2 if w2.dtype == compute_dtype else w2.astype(compute_dtype)
    b1c = b1.astype(jnp.float32).reshape(1, I)
    b2c = b2.astype(jnp.float32).reshape(1, H)

    if M_pad != M:
        x2d = jnp.pad(x2d, ((0, M_pad - M), (0, 0)))
    if I_pad != I:
        # Zero-padded W1 columns / b1 entries / W2 rows contribute exactly 0.
        w1c = jnp.pad(w1c, ((0, 0), (0, I_pad - I)))
        b1c = jnp.pad(b1c, ((0, 0), (0, I_pad - I)))
        w2c = jnp.pad(w2c, ((0, I_pad - I), (0, 0)))

    if resident:
        out = pl.pallas_call(
            _ffn_kernel_resident,
            out_shape=jax.ShapeDtypeStruct((M_pad, H), out_dtype),
            grid_spec=pltpu.PrefetchScalarGridSpec(
                num_scalar_prefetch=0,
                grid=(n_rows,),
                in_specs=[
                    pl.BlockSpec((tm, H), lambda i: (i, 0)),      # x rows
                    pl.BlockSpec((H, I_pad), lambda i: (0, 0)),   # W1 (resident)
                    pl.BlockSpec((1, I_pad), lambda i: (0, 0)),   # b1
                    pl.BlockSpec((I_pad, H), lambda i: (0, 0)),   # W2 (resident)
                    pl.BlockSpec((1, H), lambda i: (0, 0)),       # b2
                ],
                out_specs=pl.BlockSpec((tm, H), lambda i: (i, 0)),
            ),
            compiler_params=pltpu.CompilerParams(
                dimension_semantics=("parallel",),
                vmem_limit_bytes=budget,
            ),
        )(x2d, w1c, b1c, w2c, b2c)
    else:
        kernel = _ffn_kernel_streamed_acc if use_scratch else _ffn_kernel_streamed_f32out
        scratch = [pltpu.VMEM((tm, H), jnp.float32)] if use_scratch else []
        out = pl.pallas_call(
            kernel,
            out_shape=jax.ShapeDtypeStruct((M_pad, H), out_dtype),
            grid_spec=pltpu.PrefetchScalarGridSpec(
                num_scalar_prefetch=0,
                grid=(n_rows, n_k),
                in_specs=[
                    pl.BlockSpec((tm, H), lambda i, k: (i, 0)),   # x rows
                    pl.BlockSpec((H, ti), lambda i, k: (0, k)),   # W1 slice
                    pl.BlockSpec((1, ti), lambda i, k: (0, k)),   # b1 slice
                    pl.BlockSpec((ti, H), lambda i, k: (k, 0)),   # W2 slice
                    pl.BlockSpec((1, H), lambda i, k: (0, 0)),    # b2
                ],
                out_specs=pl.BlockSpec((tm, H), lambda i, k: (i, 0)),
                scratch_shapes=scratch,
            ),
            compiler_params=pltpu.CompilerParams(
                dimension_semantics=("parallel", "arbitrary"),
                vmem_limit_bytes=budget,
            ),
        )(x2d, w1c, b1c, w2c, b2c)

    if M_pad != M:
        out = out[:M]
    return out.reshape(orig_shape)


def feed_forward_ref(x, w1, b1, w2, b2):
    h = x.astype(jnp.float32) @ w1.astype(jnp.float32) + b1.astype(jnp.float32)
    h = _gelu_exact(h)
    return h @ w2.astype(jnp.float32) + b2.astype(jnp.float32)


if __name__ == "__main__":
    # config: hidden_size=32, intermediate_size=128, dropout=0.1 (eval -> identity)
    batch, seq, hidden, intermediate = 2, 8, 32, 128

    key = jax.random.PRNGKey(0)
    kx, kw1, kb1, kw2, kb2 = jax.random.split(key, 5)

    x = jax.random.normal(kx, (batch, seq, hidden), dtype=jnp.float32)

    # Deterministic parameter init (Kaiming-uniform-ish scale like nn.Linear),
    # stored pre-transposed: (in_features, out_features).
    lim1 = 1.0 / math.sqrt(hidden)
    lim2 = 1.0 / math.sqrt(intermediate)
    w1 = jax.random.uniform(kw1, (hidden, intermediate), jnp.float32, -lim1, lim1)
    b1 = jax.random.uniform(kb1, (intermediate,), jnp.float32, -lim1, lim1)
    w2 = jax.random.uniform(kw2, (intermediate, hidden), jnp.float32, -lim2, lim2)
    b2 = jax.random.uniform(kb2, (hidden,), jnp.float32, -lim2, lim2)

    y_ref = feed_forward_ref(x, w1, b1, w2, b2)

    # 1) Default path: bf16 MXU compute (f32 accumulation), weights pre-cast
    #    once outside the call (resident-weights kernel for this size).
    w1_bf = w1.astype(jnp.bfloat16)
    w2_bf = w2.astype(jnp.bfloat16)
    y_bf16 = jax.block_until_ready(feed_forward(x, w1_bf, b1, w2_bf, b2))
    assert y_bf16.shape == x.shape
    assert jnp.allclose(y_bf16, y_ref, atol=5e-2, rtol=5e-2), \
        "bf16 mismatch vs reference"

    # 2) f32 MXU path: exact match to the reference.
    y_f32 = jax.block_until_ready(
        feed_forward(x, w1, b1, w2, b2, compute_dtype=jnp.float32))
    assert y_f32.shape == x.shape
    assert jnp.allclose(y_f32, y_ref, atol=1e-5, rtol=1e-5), \
        "f32 mismatch vs reference"

    # 3) Streamed (intermediate-tiled) path, f32 output accumulated in o_ref.
    inter2 = 256
    kw1b, kb1b, kw2b, kb2b = jax.random.split(jax.random.PRNGKey(1), 4)
    lim2b = 1.0 / math.sqrt(inter2)
    w1b = jax.random.uniform(kw1b, (hidden, inter2), jnp.float32, -lim1, lim1)
    b1b = jax.random.uniform(kb1b, (inter2,), jnp.float32, -lim1, lim1)
    w2b = jax.random.uniform(kw2b, (inter2, hidden), jnp.float32, -lim2b, lim2b)
    b2b = jax.random.uniform(kb2b, (hidden,), jnp.float32, -lim2b, lim2b)
    y2_ref = feed_forward_ref(x, w1b, b1b, w2b, b2b)
    y2 = jax.block_until_ready(
        feed_forward(x, w1b, b1b, w2b, b2b, compute_dtype=jnp.float32,
                     force_streamed=True, ti_max=128))
    assert jnp.allclose(y2, y2_ref, atol=1e-5, rtol=1e-5), \
        "streamed f32 mismatch vs reference"

    # 4) Streamed path with bf16 input/output (f32 scratch accumulator).
    y2b = jax.block_until_ready(
        feed_forward(x.astype(jnp.bfloat16), w1b.astype(jnp.bfloat16), b1b,
                     w2b.astype(jnp.bfloat16), b2b,
                     force_streamed=True, ti_max=128))
    assert y2b.dtype == jnp.bfloat16
    assert jnp.allclose(y2b.astype(jnp.float32), y2_ref, atol=1e-1, rtol=1e-1), \
        "streamed bf16 mismatch vs reference"

    print("KERNEL_OK")
</pallas_src>

<mosaic_0001>
module attributes {stable_mosaic.version = 11 : i64} {
  func.func @_ffn_kernel_resident(%arg0: i32, %arg1: memref<8x32xbf16, #tpu.memory_space<vmem>>, %arg2: memref<32x128xbf16, #tpu.memory_space<vmem>>, %arg3: memref<1x128xf32, #tpu.memory_space<vmem>>, %arg4: memref<128x32xbf16, #tpu.memory_space<vmem>>, %arg5: memref<1x32xf32, #tpu.memory_space<vmem>>, %arg6: memref<8x32xf32, #tpu.memory_space<vmem>>) attributes {dimension_semantics = [#tpu.dimension_semantics<parallel>], iteration_bounds = array<i64: 2>, scalar_prefetch = 0 : i64, scratch_operands = 0 : i64, tpu.core_type = #tpu.core_type<tc>, window_params = [{transform_indices = @transform_0, window_bounds = array<i64: 8, 32>}, {pipeline_mode = #tpu.pipeline_mode<synchronous>, transform_indices = @transform_1, window_bounds = array<i64: 32, 128>}, {pipeline_mode = #tpu.pipeline_mode<synchronous>, transform_indices = @transform_2, window_bounds = array<i64: 1, 128>}, {pipeline_mode = #tpu.pipeline_mode<synchronous>, transform_indices = @transform_3, window_bounds = array<i64: 128, 32>}, {pipeline_mode = #tpu.pipeline_mode<synchronous>, transform_indices = @transform_4, window_bounds = array<i64: 1, 32>}, {transform_indices = @transform_5, window_bounds = array<i64: 8, 32>}]} {
    %c0 = arith.constant 0 : index
    %c0_0 = arith.constant 0 : index
    %0 = vector.load %arg1[%c0, %c0_0] : memref<8x32xbf16, #tpu.memory_space<vmem>>, vector<8x32xbf16>
    %c0_1 = arith.constant 0 : index
    %c0_2 = arith.constant 0 : index
    %1 = vector.load %arg2[%c0_1, %c0_2] : memref<32x128xbf16, #tpu.memory_space<vmem>>, vector<32x128xbf16>
    %cst = arith.constant dense<0.000000e+00> : vector<8x128xf32>
    %2 = tpu.matmul %0, %1, %cst {dimension_numbers = #tpu.dot_dimension_numbers<[1], [0], [0], [1], [0, 0, 1, 1], [], []>} : vector<8x32xbf16>, vector<32x128xbf16>, vector<8x128xf32> -> vector<8x128xf32>
    %c0_3 = arith.constant 0 : index
    %c0_4 = arith.constant 0 : index
    %3 = vector.load %arg3[%c0_3, %c0_4] : memref<1x128xf32, #tpu.memory_space<vmem>>, vector<1x128xf32>
    %4 = vector.broadcast %3 : vector<1x128xf32> to vector<8x128xf32>
    %5 = arith.addf %2, %4 : vector<8x128xf32>
    %cst_5 = arith.constant 5.000000e-01 : f32
    %6 = vector.broadcast %cst_5 : f32 to vector<8x128xf32>
    %7 = arith.mulf %6, %5 : vector<8x128xf32>
    %cst_6 = arith.constant 0.707106769 : f32
    %8 = vector.broadcast %cst_6 : f32 to vector<8x128xf32>
    %9 = arith.mulf %5, %8 : vector<8x128xf32>
    %10 = math.erf %9 : vector<8x128xf32>
    %cst_7 = arith.constant 1.000000e+00 : f32
    %11 = vector.broadcast %cst_7 : f32 to vector<8x128xf32>
    %12 = arith.addf %11, %10 : vector<8x128xf32>
    %13 = arith.mulf %7, %12 : vector<8x128xf32>
    %14 = arith.truncf %13 : vector<8x128xf32> to vector<8x128xbf16>
    %c0_8 = arith.constant 0 : index
    %c0_9 = arith.constant 0 : index
    %15 = vector.load %arg4[%c0_8, %c0_9] : memref<128x32xbf16, #tpu.memory_space<vmem>>, vector<128x32xbf16>
    %cst_10 = arith.constant dense<0.000000e+00> : vector<8x32xf32>
    %16 = tpu.matmul %14, %15, %cst_10 {dimension_numbers = #tpu.dot_dimension_numbers<[1], [0], [0], [1], [0, 0, 1, 1], [], []>} : vector<8x128xbf16>, vector<128x32xbf16>, vector<8x32xf32> -> vector<8x32xf32>
    %c0_11 = arith.constant 0 : index
    %c0_12 = arith.constant 0 : index
    %17 = vector.load %arg5[%c0_11, %c0_12] : memref<1x32xf32, #tpu.memory_space<vmem>>, vector<1x32xf32>
    %18 = vector.broadcast %17 : vector<1x32xf32> to vector<8x32xf32>
    %19 = arith.addf %16, %18 : vector<8x32xf32>
    %c0_13 = arith.constant 0 : index
    %c0_14 = arith.constant 0 : index
    %20 = vector.load %arg6[%c0_13, %c0_14] : memref<8x32xf32, #tpu.memory_space<vmem>>, vector<8x32xf32>
    tpu.vector_store %arg6[%c0_13, %c0_14], %19 {strides = array<i32>} : memref<8x32xf32, #tpu.memory_space<vmem>>, vector<8x32xf32>,
    return
  }
  func.func @transform_0(%arg0: i32) -> (i32, i32) {
    %c0_i32 = arith.constant 0 : i32
    %c0_i32_0 = arith.constant 0 : i32
    return %arg0, %c0_i32 : i32, i32
  }
  func.func @transform_1(%arg0: i32) -> (i32, i32) {
    %c0_i32 = arith.constant 0 : i32
    %c0_i32_0 = arith.constant 0 : i32
    %c0_i32_1 = arith.constant 0 : i32
    return %c0_i32, %c0_i32_0 : i32, i32
  }
  func.func @transform_2(%arg0: i32) -> (i32, i32) {
    %c0_i32 = arith.constant 0 : i32
    %c0_i32_0 = arith.constant 0 : i32
    %c0_i32_1 = arith.constant 0 : i32
    return %c0_i32, %c0_i32_0 : i32, i32
  }
  func.func @transform_3(%arg0: i32) -> (i32, i32) {
    %c0_i32 = arith.constant 0 : i32
    %c0_i32_0 = arith.constant 0 : i32
    %c0_i32_1 = arith.constant 0 : i32
    return %c0_i32, %c0_i32_0 : i32, i32
  }
  func.func @transform_4(%arg0: i32) -> (i32, i32) {
    %c0_i32 = arith.constant 0 : i32
    %c0_i32_0 = arith.constant 0 : i32
    %c0_i32_1 = arith.constant 0 : i32
    return %c0_i32, %c0_i32_0 : i32, i32
  }
  func.func @transform_5(%arg0: i32) -> (i32, i32) {
    %c0_i32 = arith.constant 0 : i32
    %c0_i32_0 = arith.constant 0 : i32
    return %arg0, %c0_i32 : i32, i32
  }
}

</mosaic_0001>

<bundles_post_ra>
// kernel: tpu_custom_call.1
= control target key start
LH: loop header
LB: loop body
LE: loop exit
PB: predicated region body
PF: predicated region fallthrough
CT: control target
= control target key end

     0   :  { %10 = vsyncpa [#allocation3], 0  ;;  %s831_s0 = inlined_call_operand.vmem [shape: bf16[16,32], index: 0, kind: input, shape index: {}]   ;;  %s832_s1 = inlined_call_operand.vmem [shape: bf16[32,128], index: 1, kind: input, shape index: {}]   ;;  %s833_s2 = inlined_call_operand.vmem [shape: f32[1,128], index: 2, kind: input, shape index: {}]   ;;  %s834_s3 = inlined_call_operand.vmem [shape: bf16[128,32], index: 3, kind: input, shape index: {}]   ;;  %s835_s4 = inlined_call_operand.vmem [shape: f32[1,32], index: 4, kind: input, shape index: {}]   ;;  %s836_s5 = inlined_call_operand.hbm [shape: f32[16,32], index: 5, kind: output, shape index: {}]  }
   0x1   :  { %12 = vsyncpa [#allocation3 + $0x1], 0  ;;  %s693_s18 = smov 0   ;;  %s695_s19 = smov 0  }
   0x2   :  { %s697_s20 = smov 0   ;;  %s699_s21 = smov 0  }
   0x3 LB: > { %s714_s22 = sadd.s32 4294967295, %s658_s21   ;;  %s480_s23 = sadd.s32 4294967294, %s658_s21   ;;  %s658_s21 = sphi %s699_s21, %s842_s21   ;;  %s654_s20 = sphi %s697_s20, %s841_s20   ;;  %s650_s19 = sphi %s695_s19, %s840_s19   ;;  %s646_s18 = sphi %s693_s18, %s839_s18  }
   0x4   : > { %s718_s24 = sadd.s32 1, %s658_s21   ;;  %s135_s25 = sadd.s32 1, %s654_s20 }
   0x5   : > { %s132_s26 = ssub.s32 %s658_s21, %s718_s24  ;;  %p145_p0 = scmp.ne.s32.totalorder %s654_s20, %s650_s19 }
   0x6   : > { %p133_p1 = scmp.eq.s32.totalorder %s132_s26, 0  ;;  %p146_p2 = scmp.eq.s32.totalorder %s714_s22, 1 }
   0x7   : > { %p151_p3 = scmp.ne.s32.totalorder %s650_s19, %s646_s18  ;;  %p152_p4 = scmp.eq.s32.totalorder %s480_s23, 1 }
   0x8   : > { %s729_s27 = scalar_select %p133_p1, %s654_s20, %s135_s25  }
   0x9   : > { %p731_p5 = por %p146_p2, %p145_p0  ;;  %p735_p6 = por %p152_p4, %p151_p3 }
   0xa   : > { %p483_p7 = scmp.ge.s32.totalorder %s658_s21, 1  ;;  %p189_p8 = scmp.lt.s32.totalorder %s658_s21, 3 }
   0xc   : > { %p190_p9 = pnand %p483_p7, %p189_p8 }
   0xd   : > { %v584_v0 = vld [vmem:[%s832_s1] sm:$0xff] (!%p190_p9)   ;;  %v660_v1 = vmov (!%p190_p9), 0.0   ;;  %v585_v2 = vld [vmem:[%s832_s1 + $0x8] sm:$0xff] (!%p190_p9)   ;;  %vm661_vm0 = vmmov (!%p190_p9), 0   ;;  %p216_p10 = scmp.lt.s32.totalorder (!%p190_p9), %s714_s22, 1  ;;  %vm245_vm1 = vcmask (!%p190_p9), 261120  }
   0xe   : > { %193 = sbr.rel (%p190_p9) target bundleno = 487 (0x1e7), region = 40  ;;  %515 = vmatprep.subr.bf16.mxu0 (!%p190_p9), %v660_v1  ;;  %523 = vmatprep.subr.bf16.mxu1 (!%p190_p9), %v660_v1  ;;  %v586_v3 = vld [vmem:[%s834_s3] sm:$0xff] (!%p190_p9)   ;;  %v587_v4 = vld [vmem:[%s834_s3 + $0x8] sm:$0xff] (!%p190_p9)   ;;  %v588_v6 = vld [vmem:[%s834_s3 + $0x10] sm:$0xff] (!%p190_p9)   ;;  %s213_s16 = sand.u32 (!%p190_p9), 1, %s650_s19  }
   0xf   : > { %516 = vmatpush3.bf16.msra.mxu0 (!%p190_p9), %v584_v0  ;;  %519 = vmatprep.mubr.msk.bf16.mxu0 (!%p190_p9), %vm661_vm0, %v660_v1  ;;  %v589_v7 = vld [vmem:[%s834_s3 + $0x18] sm:$0xff] (!%p190_p9)   ;;  %v590_v8 = vld [vmem:[%s834_s3 + $0x20] sm:$0xff] (!%p190_p9)   ;;  %v591_v9 = vld [vmem:[%s834_s3 + $0x28] sm:$0xff] (!%p190_p9)   ;;  %s500_s26 = sshll.u32 (!%p190_p9), %s714_s22, 7 }
  0x10   : > { %517 = vmatprep.subr.bf16.mxu0 (!%p190_p9), %v660_v1  ;;  %539 = vmatprep.mubr.msk.bf16.mxu1 (!%p190_p9), %vm661_vm0, %v660_v1  ;;  %v592_v10 = vld [vmem:[%s834_s3 + $0x30] sm:$0xff] (!%p190_p9)   ;;  %v593_v11 = vld [vmem:[%s834_s3 + $0x38] sm:$0xff] (!%p190_p9)   ;;  %v486_v12 = vld [vmem:[%s833_s2] ss:$0 sm:$0xff] (!%p190_p9)  ;;  %s788_s9 = scalar_lea.hbm (!%p190_p9), %s836_s5, %s500_s26 }
  0x11   : > { %524 = vmatpush3.bf16.msra.mxu1 (!%p190_p9), %v586_v3  ;;  %v490_v24 = vld [vmem:[%s835_s4] ss:$0 sm:$0xff] (!%p190_p9) }
  0x12   : > { %525 = vmatprep.subr.bf16.mxu1 (!%p190_p9), %v660_v1 }
  0x13   : > { %518 = vmatpush3.bf16.msra.mxu0 (!%p190_p9), %v585_v2 }
  0x15   : > { %s217_s11 = scalar_select %p216_p10, %s714_s22, 1  ;;  %526 = vmatpush3.bf16.msra.mxu1 %v587_v4 }
  0x16   : > { %527 = vmatprep.subr.bf16.mxu1 %v660_v1  ;;  %s408_s22 = scalar_lea.sflag [#allocation3], %s213_s16 }
  0x17   : > { %s485_s14 = sshll.u32 %s217_s11, 2  ;;  %s662_s11 = smov [#allocation2]  }
  0x18   : > { %s219_s17 = scalar_lea.vmem %s831_s0, %s485_s14  ;;  %s600_s12 = sshll.u32 %s662_s11, 4  ;;  %s601_s12 = int_to_ptr.vmem [resolvable:$false] %s600_s12 }
  0x19   : > { %v221_v5 = vld [vmem:[%s219_s17] sm:$0xf]  ;;  %528 = vmatpush3.bf16.msra.mxu1 %v588_v6  ;;  %s484_s17 = sshll.u32 %s213_s16, 3  ;;  %s602_s13 = scalar_lea.vmem %s601_s12, 256 }
  0x1a   : > { %520 = vmatmul.mubr.msk.bf16.vlgmr.msra.gmra.mrb[0].mxu0 %vm245_vm1, %v221_v5  ;;  %529 = vmatprep.subr.bf16.mxu1 %v660_v1  ;;  %s215_s30 = scalar_lea.vmem [#allocation2], %s484_s17 }
  0x1b   : > { %s421_s6 = sshll.u32 %s215_s30, 4  ;;  %s790_s6 = int_to_ptr.vmem [resolvable:$true] %s421_s6 }
  0x1c   : > { %s596_s10 = scalar_lea.vmem %s790_s6, 128  ;;  %p603_p0 = scmp.lt.s32.totalorder %s790_s6, %s601_s12 }
  0x1d   : > { %530 = vmatpush3.bf16.msra.mxu1 %v589_v7  ;;  %p597_p11 = scmp.ne.s32.totalorder %s790_s6, %s596_s10  ;;  %p604_p1 = scmp.lt.s32.totalorder %s602_s13, %s596_s10 }
  0x1e   : > { %531 = vmatprep.subr.bf16.mxu1 %v660_v1 }
  0x1f   : > { %p598_p12 = pnand %p597_p11, %p731_p5  ;;  %p605_p2 = por %p604_p1, %p603_p0 }
  0x21   : > { %532 = vmatpush3.bf16.msra.mxu1 %v590_v8  ;;  %p599_p13 = pneg %p598_p12 }
  0x22   : > { %533 = vmatprep.subr.bf16.mxu1 %v660_v1 }
  0x23   : > { %p606_p3 = pnand %p605_p2, %p599_p13 }
  0x25   : > { %534 = vmatpush3.bf16.msra.mxu1 %v591_v9 }
  0x26   : > { %535 = vmatprep.subr.bf16.mxu1 %v660_v1 }
  0x29   : > { %536 = vmatpush3.bf16.msra.mxu1 %v592_v10 }
  0x2a   : > { %537 = vmatprep.subr.bf16.mxu1 %v660_v1 }
  0x2d   : > { %538 = vmatpush3.bf16.msra.mxu1 %v593_v11 }
  0xed   : > { %v283_v13 = vpop.f32.mrb[0].mxu0 }
  0xee   : > { %v284_v14 = vadd.f32 %v486_v12, %v283_v13  ;;  %v521_v15 = vpop.f32.mrb[1].mxu0 }
  0xef   : > { %v286_v16 = vpop.f32.mrb[2].mxu0 }
  0xf0   : > { %v290_v17 = vmul.f32 0.70710677, %v284_v14  ;;  %v522_v18 = vpop.f32.mrb[3].mxu0  ;;  %v289_v20 = vmul.f32 0.5, %v284_v14 }
  0xf2   : > { %594 = verf.f32 %v290_v17 }
  0xfc   : > { %v595_v19 = vpop.eup %594 }
  0xfd   : > { %v292_v21 = vadd.f32 1.0, %v595_v19 }
  0xff   : > { %v293_v22 = vmul.f32 %v292_v21, %v289_v20 }
 0x101   : > { %v294_v23 = vpack.c.bf16 %v293_v22, %v293_v22 }
 0x103   : > { %540 = vmatmul.mubr.bf16.vlgmr.msra.gmra.mrb[0].mxu1 %v294_v23 }
 0x1d6   : > { %v400_v25 = vpop.f32.mrb[0].mxu1 }
 0x1d7   : > { %v401_v26 = vadd.f32 %v490_v24, %v400_v25  ;;  %v541_v27 = vpop.f32.mrb[1].mxu1 }
 0x1d8   : > { %v403_v28 = vpop.f32.mrb[2].mxu1 }
 0x1d9   : > { %v542_v29 = vpop.f32.mrb[3].mxu1  ;;  %406 = vst.msk [vmem:[%s215_s30] sm:$0xff] %vm245_vm1, %v401_v26 }
 0x1da   : > { %609 = shalt.err (!%p606_p3)
}
 0x1db   : > { %s610_s14 = scalar_lea.hbm %s788_s9, 128  ;;  %s614_s17 = scalar_lea.hbm %s836_s5, 256 }
 0x1dc   : > { %p611_p4 = scmp.ne.s32.totalorder %s788_s9, %s610_s14  ;;  %p615_p9 = scmp.lt.u32.totalorder %s788_s9, %s836_s5 }
 0x1dd   : > { %p616_p10 = scmp.lt.u32.totalorder %s614_s17, %s610_s14  ;;  %p618_p12 = scmp.lt.u32.totalorder %s610_s14, %s788_s9 }
 0x1de   : > { %p612_p7 = pnand %p611_p4, %p731_p5 }
 0x1df   : > { %p617_p11 = por %p616_p10, %p615_p9 }
 0x1e0   : > { %p613_p8 = pneg %p612_p7 }
 0x1e1   : > { %p619_p13 = por %p618_p12, %p617_p11 }
 0x1e3   : > { %p620_p0 = pnand %p619_p13, %p613_p8 }
 0x1e5   : > { %623 = shalt.err (!%p620_p0)
}
 0x1e6   : > { %543 = dma.vmem_to_hbm [thread:$0]  (%p731_p5), %s790_s6, 128, %s788_s9, %s408_s22  }
 0x1e7 PF: > { %p549_p1 = scmp.ge.s32.totalorder %s658_s21, 2  ;;  %s433_s26 = sand.u32 1, %s646_s18  }
 0x1e8   : > { %s434_s30 = scalar_lea.sflag [#allocation3], %s433_s26 }
 0x1e9   : > { %p546_p2 = pnand %p549_p1, %p735_p6 }
 0x1eb   : > { %641 = dma.done.wait (!%p546_p2), %s434_s30, 128  }
 0x1ec   : > { %643 = vsyncadd (!%p546_p2), %s434_s30, 4294967168  ;;  %p15_p3 = scmp.ge.s32.totalorder %s718_s24, 4   ;;  %s839_s18 = smov %s650_s19 }
 0x1ed   : > { %s840_s19 = smov %s654_s20  ;;  %s841_s20 = smov %s729_s27 }
 0x1ee   : > { %s842_s21 = smov %s718_s24  ;;  %17 = sbr.rel (!%p15_p3) target bundleno = 3 (0x3), region = 75 }
 0x1f5   :  { %439 = vsyncpa [#allocation3], 1 }
 0x1f6   :  { %441 = vsyncpa [#allocation3 + $0x1], 1 }

</bundles_post_ra>
